<compile_context>
chip_gen: v5e
topology: v5e:2x2
jax: 0.10.0
libtpu: 0.0.40
codegen_flags: <defaults>
</compile_context>

<pallas_src>
import functools

import jax
import jax.numpy as jnp
from jax.experimental import pallas as pl
from jax.experimental.pallas import tpu as pltpu


# ---------------------------------------------------------------------------
# Activation math (VPU/EUP inside the kernel)
# ---------------------------------------------------------------------------
def _apply_activation(x, activation_type: str):
    at = activation_type.lower()
    if at == "relu":
        return jnp.maximum(x, jnp.zeros((), x.dtype))
    elif at in ("swish", "silu"):
        return x * jax.nn.sigmoid(x)
    elif at == "tanh":
        return jnp.tanh(x)
    elif at == "gelu":
        # exact (erf-based) gelu, like torch.nn.functional.gelu default
        inv_sqrt2 = jnp.asarray(0.7071067811865476, x.dtype)
        return 0.5 * x * (1.0 + jax.lax.erf(x * inv_sqrt2))
    elif at in ("gelu_new", "gelu_tanh"):
        # HF "new" gelu: tanh approximation
        c = jnp.asarray(0.7978845608028654, x.dtype)  # sqrt(2/pi)
        return 0.5 * x * (1.0 + jnp.tanh(c * (x + 0.044715 * x * x * x)))
    elif at in ("leakyrelu", "leaky_relu"):
        return jnp.where(x >= 0, x, 0.01 * x)
    else:
        raise ValueError(f"unsupported activation_type: {activation_type}")


# ---------------------------------------------------------------------------
# Pallas kernel: elementwise activation on a (tile_rows, W) tile
# ---------------------------------------------------------------------------
def _activation_kernel(x_ref, o_ref, *, activation_type: str):
    o_ref[...] = _apply_activation(x_ref[...], activation_type).astype(o_ref.dtype)


# ---------------------------------------------------------------------------
# Layout / tiling helpers
# ---------------------------------------------------------------------------
def _choose_2d_view(x):
    """Pick a lane-dense 2-D view: (rows, W) with W a large multiple of 128."""
    n = x.size
    for w in (4096, 2048, 1024, 512, 256, 128):
        if n % w == 0:
            return x.reshape(n // w, w)
    # Fallback: keep the original last dim as the lane axis (full-width block).
    if x.ndim >= 2:
        return x.reshape(-1, x.shape[-1])
    return x.reshape(1, n)


def _choose_tile_rows(rows, width, itemsize, target_bytes):
    """Block sized by bytes, rows rounded to the dtype's sublane multiple."""
    sub = max(8, 32 // max(itemsize, 1))  # f32 -> 8, bf16 -> 16, int8/fp8 -> 32
    t = target_bytes // max(width * itemsize, 1)
    t = (t // sub) * sub
    t = max(t, sub)
    if t >= rows:
        return rows  # single full block (block dim == array dim is always legal)
    return t


# ---------------------------------------------------------------------------
# Wrapper: Pallas equivalent of Activations(activation_type)(x)
# ---------------------------------------------------------------------------
def activations_forward(x, activation_type: str = "gelu_new",
                        target_block_bytes: int = 2 << 20):
    orig_shape = x.shape
    x2 = _choose_2d_view(x)
    rows, width = x2.shape
    itemsize = jnp.dtype(x2.dtype).itemsize

    tile_rows = _choose_tile_rows(rows, width, itemsize, target_block_bytes)
    grid = (pl.cdiv(rows, tile_rows),)  # ragged last block handled by Pallas

    kernel = functools.partial(_activation_kernel, activation_type=activation_type)

    out = pl.pallas_call(
        kernel,
        out_shape=jax.ShapeDtypeStruct((rows, width), x.dtype),
        grid_spec=pltpu.PrefetchScalarGridSpec(
            num_scalar_prefetch=0,
            grid=grid,
            in_specs=[pl.BlockSpec((tile_rows, width), lambda i: (i, 0))],
            out_specs=pl.BlockSpec((tile_rows, width), lambda i: (i, 0)),
        ),
        compiler_params=pltpu.CompilerParams(
            dimension_semantics=("parallel",)),
    )(x2)

    return out.reshape(orig_shape)


# ---------------------------------------------------------------------------
# Reference (pure JAX) for verification
# ---------------------------------------------------------------------------
def activations_ref(x, activation_type: str):
    return _apply_activation(x, activation_type)


if __name__ == "__main__":
    key = jax.random.PRNGKey(0)
    ok = True
    acts = ["relu", "gelu", "gelu_new", "swish", "tanh", "leakyrelu"]

    # Small adapter-bottleneck-shaped input: (batch, seq, hidden)
    x_small = jax.random.normal(key, (2, 8, 32), dtype=jnp.float32)
    for act in acts:
        y = jax.block_until_ready(activations_forward(x_small, activation_type=act))
        y_ref = activations_ref(x_small, act)
        if not jnp.allclose(y, y_ref, atol=1e-5, rtol=1e-5):
            ok = False
            print(f"MISMATCH (small) for {act}: max err "
                  f"{float(jnp.max(jnp.abs(y - y_ref)))}")

    # A modestly larger, non-divisible shape with a small block target to
    # exercise the multi-block path and the ragged last block (no pad/slice).
    x_med = jax.random.normal(jax.random.PRNGKey(1), (3, 1000, 64),
                              dtype=jnp.float32)
    for act in acts:
        y = jax.block_until_ready(
            activations_forward(x_med, activation_type=act,
                                target_block_bytes=64 * 1024))
        y_ref = activations_ref(x_med, act)
        if not jnp.allclose(y, y_ref, atol=1e-5, rtol=1e-5):
            ok = False
            print(f"MISMATCH (med) for {act}: max err "
                  f"{float(jnp.max(jnp.abs(y - y_ref)))}")

    if ok:
        print("KERNEL_OK")
</pallas_src>

<mosaic_0001>
module attributes {stable_mosaic.version = 11 : i64} {
  func.func @_activation_kernel(%arg0: i32, %arg1: memref<1x512xf32, #tpu.memory_space<vmem>>, %arg2: memref<1x512xf32, #tpu.memory_space<vmem>>) attributes {dimension_semantics = [#tpu.dimension_semantics<parallel>], iteration_bounds = array<i64: 1>, scalar_prefetch = 0 : i64, scratch_operands = 0 : i64, tpu.core_type = #tpu.core_type<tc>, window_params = [{transform_indices = @transform_0, window_bounds = array<i64: 1, 512>}, {transform_indices = @transform_1, window_bounds = array<i64: 1, 512>}]} {
    %c0 = arith.constant 0 : index
    %c0_0 = arith.constant 0 : index
    %0 = vector.load %arg1[%c0, %c0_0] : memref<1x512xf32, #tpu.memory_space<vmem>>, vector<1x512xf32>
    %cst = arith.constant 0.000000e+00 : f32
    %1 = vector.broadcast %cst : f32 to vector<1x512xf32>
    %2 = arith.maximumf %0, %1 : vector<1x512xf32>
    %c0_1 = arith.constant 0 : index
    %c0_2 = arith.constant 0 : index
    %3 = vector.load %arg2[%c0_1, %c0_2] : memref<1x512xf32, #tpu.memory_space<vmem>>, vector<1x512xf32>
    tpu.vector_store %arg2[%c0_1, %c0_2], %2 {strides = array<i32>} : memref<1x512xf32, #tpu.memory_space<vmem>>, vector<1x512xf32>,
    return
  }
  func.func @transform_0(%arg0: i32) -> (i32, i32) {
    %c0_i32 = arith.constant 0 : i32
    %c0_i32_0 = arith.constant 0 : i32
    return %arg0, %c0_i32 : i32, i32
  }
  func.func @transform_1(%arg0: i32) -> (i32, i32) {
    %c0_i32 = arith.constant 0 : i32
    %c0_i32_0 = arith.constant 0 : i32
    return %arg0, %c0_i32 : i32, i32
  }
}

</mosaic_0001>

<bundles_post_ra>
// kernel: tpu_custom_call.1
= control target key start
LH: loop header
LB: loop body
LE: loop exit
PB: predicated region body
PF: predicated region fallthrough
CT: control target
= control target key end

     0   :  { %6 = vsyncpa [#allocation3], 0  ;;  %s119_s0 = inlined_call_operand.hbm [shape: f32[1,512], index: 0, kind: input, shape index: {}]   ;;  %s120_s1 = inlined_call_operand.hbm [shape: f32[1,512], index: 1, kind: output, shape index: {}]  }
   0x1   :  { %7 = vsyncpa [#allocation4], 0  ;;  %s13_s8 = sshll.u32 %s119_s0, 4  ;;  %s101_s9 = smov [#allocation2]   ;;  %s14_s8 = int_to_ptr.hbm [resolvable:$true] %s13_s8 }
   0x2   :  { %s15_s10 = sshll.u32 %s101_s9, 4  ;;  %s16_s10 = int_to_ptr.vmem [resolvable:$true] %s15_s10 }
   0x3   :  { %18 = dma.hbm_to_vmem [thread:$0]  %s14_s8, 64, %s16_s10, [#allocation3]  }
   0x4   :  { %97 = dma.done.wait [#allocation3], 64  }
   0x5   :  { %98 = vsyncadd [#allocation3], 4294967232  ;;  %v25_v0 = vlaneseq  ;;  %s102_s11 = smov [#allocation5]   ;;  %s37_s15 = sshll.u32 %s120_s1, 4  ;;  %v23_v1 = vld [vmem:[#allocation2] sm:$0xf]  ;;  %s38_s15 = int_to_ptr.hbm [resolvable:$true] %s37_s15 }
   0x6   :  { %s35_s12 = sshll.u32 %s102_s11, 4  ;;  %v24_v2 = vmax.f32 %v23_v1, 0.0  ;;  %s36_s12 = int_to_ptr.vmem [resolvable:$true] %s35_s12 }
   0x7   :  { %vm27_vm0 = vcmp.lt.s32.totalorder %v25_v0, 512 }
   0x8   :  { %29 = vst.msk [vmem:[#allocation5] sm:$0xf] %vm27_vm0, %v24_v2 }
   0x9   :  { %40 = dma.vmem_to_hbm [thread:$0]  %s36_s12, 64, %s38_s15, [#allocation4]  }
   0xa   :  { %99 = dma.done.wait [#allocation4], 64  }
   0xb   :  { %100 = vsyncadd [#allocation4], 4294967232 }
   0xc   :  { %45 = vsyncpa [#allocation3], 1 }
   0xd   :  { %46 = vsyncpa [#allocation4], 1 }

</bundles_post_ra>
